<compile_context>
chip_gen: v6e
topology: v6e:2x2x1
jax: 0.10.0
libtpu: 0.0.40
codegen_flags: <defaults>
</compile_context>

<pallas_src>
import functools

import jax
import jax.numpy as jnp
from jax.experimental import pallas as pl
from jax.experimental.pallas import tpu as pltpu

LANE = 128
EPS = 1e-6


def _round_up(x, m):
    return ((x + m - 1) // m) * m


def _pad2(arr, rows, cols):
    r, c = arr.shape
    return jnp.pad(arr, ((0, rows - r), (0, cols - c)))


def _vmem_limit_bytes():
    """Physical-VMEM-aware scoped limit.  Called eagerly (outside jit)."""
    phys = 128 << 20
    try:
        phys = int(getattr(pltpu.get_tpu_info(), "vmem_capacity_bytes", phys))
    except Exception:
        pass
    if phys <= (64 << 20):              # v7x: 64 MiB physical, leave ~8 MiB headroom
        return max(32 << 20, phys - (8 << 20))
    return min(96 << 20, phys * 3 // 4)  # v5e / v6e: 96 MiB


def _plan(n, in_feats, hidden, hidden2, out_feats):
    """Eager (outside jit) choice of fused-vs-tiled and tile sizes."""
    vmem_limit = _vmem_limit_bytes()
    f_pad = _round_up(in_feats, LANE)
    h_pad = _round_up(hidden, LANE)
    h2_pad = _round_up(hidden2, LANE)
    o_pad = _round_up(out_feats, LANE)

    # Fused path footprint: single-buffered whole-array operands + f32 intermediates.
    n128 = _round_up(n, LANE)
    fused_bytes = (n128 * n128 * 2                                     # A (bf16)
                   + n128 * (f_pad + h_pad) * 2                        # X, h1(bf16)
                   + n128 * (f_pad + 3 * h_pad + h2_pad + o_pad) * 4   # f32 temps
                   + (f_pad * h_pad + h_pad * h_pad + h_pad * h2_pad
                      + h2_pad * o_pad) * 4
                   + (1 << 20))
    if fused_bytes <= vmem_limit // 2:
        return dict(fused=True, n_pad=n128, tm=n128, vmem_limit=int(vmem_limit))

    # Tiled path: 512x512 A tiles; VMEM footprint bounded independent of N via K-tiling.
    tm = 512
    return dict(fused=False, n_pad=_round_up(n, tm), tm=tm, vmem_limit=int(vmem_limit))


# --------------------------------------------------------------------------- kernels
def _fused_kernel(a_ref, x_ref, w1_ref, b1_ref, w2_ref, b2_ref,
                  wm1_ref, bm1_ref, wm2_ref, bm2_ref, o_ref):
    a = a_ref[...]                                                       # bf16
    # GraphConv 1
    ax = jnp.dot(a, x_ref[...], preferred_element_type=jnp.float32)
    h1 = jnp.dot(ax, w1_ref[...], preferred_element_type=jnp.float32) + b1_ref[...]
    # GraphConv 2 (h1 rounded to bf16, matching the tiled path's stored h1)
    ah = jnp.dot(a, h1.astype(jnp.bfloat16), preferred_element_type=jnp.float32)
    h = jnp.dot(ah, w2_ref[...], preferred_element_type=jnp.float32) + b2_ref[...]
    # MLP
    h = jnp.dot(h, wm1_ref[...], preferred_element_type=jnp.float32) + bm1_ref[...]
    h = jnp.maximum(h, 0.0)
    h = jnp.dot(h, wm2_ref[...], preferred_element_type=jnp.float32) + bm2_ref[...]
    # proj: per-row L2 norm, abs, eps floor.  Padded output lanes are exactly zero
    # (zero-padded Wm2 / bm2), so they do not perturb the norm.  rsqrt runs on the EUP.
    sum_sq = jnp.sum(h * h, axis=1, keepdims=True)
    inv_norm = jax.lax.rsqrt(jnp.maximum(sum_sq, 1e-30))
    o_ref[...] = jnp.maximum(jnp.abs(h) * inv_norm, EPS)


def _conv1_kernel(a_ref, x_ref, w1_ref, b1_ref, h1_ref, acc_ref):
    k = pl.program_id(1)

    @pl.when(k == 0)
    def _():
        acc_ref[...] = jnp.zeros_like(acc_ref)

    acc_ref[...] += jnp.dot(a_ref[...], x_ref[...],
                            preferred_element_type=jnp.float32)

    @pl.when(k == pl.num_programs(1) - 1)
    def _():
        h1 = jnp.dot(acc_ref[...], w1_ref[...],
                     preferred_element_type=jnp.float32) + b1_ref[...]
        h1_ref[...] = h1.astype(h1_ref.dtype)


def _conv2_mlp_proj_kernel(a_ref, h1_ref, w2_ref, b2_ref,
                           wm1_ref, bm1_ref, wm2_ref, bm2_ref, o_ref, acc_ref):
    k = pl.program_id(1)

    @pl.when(k == 0)
    def _():
        acc_ref[...] = jnp.zeros_like(acc_ref)

    acc_ref[...] += jnp.dot(a_ref[...], h1_ref[...],
                            preferred_element_type=jnp.float32)

    @pl.when(k == pl.num_programs(1) - 1)
    def _():
        h = jnp.dot(acc_ref[...], w2_ref[...],
                    preferred_element_type=jnp.float32) + b2_ref[...]
        h = jnp.dot(h, wm1_ref[...], preferred_element_type=jnp.float32) + bm1_ref[...]
        h = jnp.maximum(h, 0.0)
        h = jnp.dot(h, wm2_ref[...], preferred_element_type=jnp.float32) + bm2_ref[...]
        sum_sq = jnp.sum(h * h, axis=1, keepdims=True)
        inv_norm = jax.lax.rsqrt(jnp.maximum(sum_sq, 1e-30))
        o_ref[...] = jnp.maximum(jnp.abs(h) * inv_norm, EPS)


# --------------------------------------------------------------------------- wrapper
@functools.partial(jax.jit, static_argnames=("fused", "n_pad", "tm", "vmem_limit"))
def _forward_padded(a_norm, x, params, *, fused, n_pad, tm, vmem_limit):
    n, in_feats = x.shape
    hidden = params["w1"].shape[1]
    hidden2 = params["wm1"].shape[1]
    out_feats = params["wm2"].shape[1]

    f_pad = _round_up(in_feats, LANE)
    h_pad = _round_up(hidden, LANE)
    h2_pad = _round_up(hidden2, LANE)
    o_pad = _round_up(out_feats, LANE)

    # Zero-padded, lane-dense operands.  A / X travel as bf16; weights stay f32.
    a_p = _pad2(a_norm, n_pad, n_pad).astype(jnp.bfloat16)
    x_p = _pad2(x, n_pad, f_pad).astype(jnp.bfloat16)
    w1 = _pad2(params["w1"], f_pad, h_pad)
    b1 = _pad2(params["b1"], 1, h_pad)
    w2 = _pad2(params["w2"], h_pad, h_pad)
    b2 = _pad2(params["b2"], 1, h_pad)
    wm1 = _pad2(params["wm1"], h_pad, h2_pad)
    bm1 = _pad2(params["bm1"], 1, h2_pad)
    wm2 = _pad2(params["wm2"], h2_pad, o_pad)
    bm2 = _pad2(params["bm2"], 1, o_pad)

    if fused:
        # Whole problem in one invocation, everything resident in VMEM (no grid =>
        # single-buffered operands, single pass over A, no h1 HBM round trip).
        out_p = pl.pallas_call(
            _fused_kernel,
            out_shape=jax.ShapeDtypeStruct((n_pad, o_pad), jnp.float32),
            compiler_params=pltpu.CompilerParams(vmem_limit_bytes=vmem_limit),
        )(a_p, x_p, w1, b1, w2, b2, wm1, bm1, wm2, bm2)
        return out_p[:n, :out_feats]

    tk = tm
    grid = (n_pad // tm, n_pad // tk)
    cparams = pltpu.CompilerParams(
        dimension_semantics=("parallel", "arbitrary"),
        vmem_limit_bytes=vmem_limit,
    )

    # ---- kernel 1: GraphConv 1 -> h1 (bf16) ----
    cost1 = pl.CostEstimate(
        flops=2 * n_pad * n_pad * f_pad + 2 * n_pad * f_pad * h_pad,
        transcendentals=0,
        bytes_accessed=(n_pad * n_pad * 2 + n_pad * f_pad * 2
                        + f_pad * h_pad * 4 + n_pad * h_pad * 2),
    )
    h1 = pl.pallas_call(
        _conv1_kernel,
        out_shape=jax.ShapeDtypeStruct((n_pad, h_pad), jnp.bfloat16),
        grid_spec=pltpu.PrefetchScalarGridSpec(
            num_scalar_prefetch=0,
            grid=grid,
            in_specs=[
                pl.BlockSpec((tm, tk), lambda i, k: (i, k)),       # A tile
                pl.BlockSpec((tk, f_pad), lambda i, k: (k, 0)),    # X K-tile
                pl.BlockSpec((f_pad, h_pad), lambda i, k: (0, 0)),  # W1 (resident)
                pl.BlockSpec((1, h_pad), lambda i, k: (0, 0)),      # b1
            ],
            out_specs=pl.BlockSpec((tm, h_pad), lambda i, k: (i, 0)),
            scratch_shapes=[pltpu.VMEM((tm, f_pad), jnp.float32)],
        ),
        compiler_params=cparams,
        cost_estimate=cost1,
    )(a_p, x_p, w1, b1)

    # ---- kernel 2: GraphConv 2 + MLP + proj ----
    cost2 = pl.CostEstimate(
        flops=(2 * n_pad * n_pad * h_pad + 2 * n_pad * h_pad * h_pad
               + 2 * n_pad * h_pad * h2_pad + 2 * n_pad * h2_pad * o_pad),
        transcendentals=n_pad,
        bytes_accessed=(n_pad * n_pad * 2 + n_pad * h_pad * 2
                        + (h_pad * h_pad + h_pad * h2_pad + h2_pad * o_pad) * 4
                        + n_pad * o_pad * 4),
    )
    out_p = pl.pallas_call(
        _conv2_mlp_proj_kernel,
        out_shape=jax.ShapeDtypeStruct((n_pad, o_pad), jnp.float32),
        grid_spec=pltpu.PrefetchScalarGridSpec(
            num_scalar_prefetch=0,
            grid=grid,
            in_specs=[
                pl.BlockSpec((tm, tk), lambda i, k: (i, k)),        # A tile
                pl.BlockSpec((tk, h_pad), lambda i, k: (k, 0)),     # h1 K-tile
                pl.BlockSpec((h_pad, h_pad), lambda i, k: (0, 0)),  # W2
                pl.BlockSpec((1, h_pad), lambda i, k: (0, 0)),      # b2
                pl.BlockSpec((h_pad, h2_pad), lambda i, k: (0, 0)),  # Wm1
                pl.BlockSpec((1, h2_pad), lambda i, k: (0, 0)),      # bm1
                pl.BlockSpec((h2_pad, o_pad), lambda i, k: (0, 0)),  # Wm2
                pl.BlockSpec((1, o_pad), lambda i, k: (0, 0)),       # bm2
            ],
            out_specs=pl.BlockSpec((tm, o_pad), lambda i, k: (i, 0)),
            scratch_shapes=[pltpu.VMEM((tm, h_pad), jnp.float32)],
        ),
        compiler_params=cparams,
        cost_estimate=cost2,
    )(a_p, h1, w2, b2, wm1, bm1, wm2, bm2)

    return out_p[:n, :out_feats]


def gnn_forward(a_norm, x, params):
    n, in_feats = x.shape
    hidden = params["w1"].shape[1]
    hidden2 = params["wm1"].shape[1]
    out_feats = params["wm2"].shape[1]
    plan = _plan(n, in_feats, hidden, hidden2, out_feats)
    return _forward_padded(a_norm, x, params, **plan)


# --------------------------------------------------------------------------- reference
def _reference_forward(a_norm, x, params):
    # Pure-JAX reference.  A / X / h1 are rounded to bf16 exactly as the kernels use
    # them (accumulation stays f32), so this checks kernel logic at matched precision.
    a = a_norm.astype(jnp.bfloat16).astype(jnp.float32)
    xb = x.astype(jnp.bfloat16).astype(jnp.float32)
    h1 = a @ xb @ params["w1"] + params["b1"]
    h1 = h1.astype(jnp.bfloat16).astype(jnp.float32)
    h = a @ h1 @ params["w2"] + params["b2"]
    h = jnp.maximum(h @ params["wm1"] + params["bm1"], 0.0) @ params["wm2"] + params["bm2"]
    sum_sq = jnp.sum(h * h, axis=1, keepdims=True)
    scaled = jnp.abs(h) / jnp.sqrt(jnp.maximum(sum_sq, 1e-30))
    return jnp.maximum(scaled, EPS)


# --------------------------------------------------------------------------- test data
def make_params(key, in_feats, hidden_feats, out_feats):
    ks = jax.random.split(key, 8)
    scale = 0.1
    return {
        "w1":  scale * jax.random.normal(ks[0], (in_feats, hidden_feats), jnp.float32),
        "b1":  scale * jax.random.normal(ks[1], (1, hidden_feats), jnp.float32),
        "w2":  scale * jax.random.normal(ks[2], (hidden_feats, hidden_feats), jnp.float32),
        "b2":  scale * jax.random.normal(ks[3], (1, hidden_feats), jnp.float32),
        "wm1": scale * jax.random.normal(ks[4], (hidden_feats, 2 * hidden_feats), jnp.float32),
        "bm1": scale * jax.random.normal(ks[5], (1, 2 * hidden_feats), jnp.float32),
        "wm2": scale * jax.random.normal(ks[6], (2 * hidden_feats, out_feats), jnp.float32),
        "bm2": scale * jax.random.normal(ks[7], (1, out_feats), jnp.float32),
    }


def make_graph(key, n_nodes):
    # Ring graph + random symmetric edges (deg >= 1 so GraphConv(norm='both') is well
    # defined), symmetrically normalized like dgl.
    adj = jnp.zeros((n_nodes, n_nodes), jnp.float32)
    idx = jnp.arange(n_nodes)
    adj = adj.at[idx, (idx + 1) % n_nodes].set(1.0)
    adj = adj.at[(idx + 1) % n_nodes, idx].set(1.0)
    extra = (jax.random.uniform(key, (n_nodes, n_nodes)) > 0.7).astype(jnp.float32)
    adj = jnp.clip(adj + extra + extra.T, 0.0, 1.0)
    adj = adj * (1.0 - jnp.eye(n_nodes))  # no self loops (dgl default)
    deg = jnp.sum(adj, axis=1)
    d_inv_sqrt = 1.0 / jnp.sqrt(jnp.maximum(deg, 1.0))
    return d_inv_sqrt[:, None] * adj * d_inv_sqrt[None, :]


if __name__ == "__main__":
    in_feats, hidden_feats, out_feats = 4, 32, 4

    key = jax.random.PRNGKey(0)
    k_g1, k_f1, k_param, k_g2, k_f2 = jax.random.split(key, 5)
    params = make_params(k_param, in_feats, hidden_feats, out_feats)

    # 1) Tiny graph -> exercises the fused single-call path (as in the harness).
    n_small = 8
    a_small = make_graph(k_g1, n_small)
    x_small = jax.random.normal(k_f1, (n_small, in_feats), jnp.float32)
    out_small = jax.block_until_ready(gnn_forward(a_small, x_small, params))
    ref_small = _reference_forward(a_small, x_small, params)
    assert out_small.shape == (n_small, out_feats)
    assert jnp.allclose(out_small, ref_small, atol=1e-2, rtol=1e-2), \
        "fused path mismatch vs JAX reference"

    # 2) Larger graph with the K-tiled two-pass path forced (small tile so the
    #    row x reduction grid is 2x2), validating the accumulator/init/finalize logic.
    n_big = 300
    a_big = make_graph(k_g2, n_big)
    x_big = jax.random.normal(k_f2, (n_big, in_feats), jnp.float32)
    out_big = jax.block_until_ready(
        _forward_padded(a_big, x_big, params,
                        fused=False, n_pad=512, tm=256,
                        vmem_limit=_vmem_limit_bytes()))
    ref_big = _reference_forward(a_big, x_big, params)
    assert out_big.shape == (n_big, out_feats)
    assert jnp.allclose(out_big, ref_big, atol=1e-2, rtol=1e-2), \
        "tiled path mismatch vs JAX reference"

    print("KERNEL_OK")
</pallas_src>

<mosaic_0001>
module attributes {stable_mosaic.version = 11 : i64} {
  func.func @_fused_kernel(%arg0: memref<128x128xbf16, #tpu.memory_space<vmem>>, %arg1: memref<128x128xbf16, #tpu.memory_space<vmem>>, %arg2: memref<128x128xf32, #tpu.memory_space<vmem>>, %arg3: memref<1x128xf32, #tpu.memory_space<vmem>>, %arg4: memref<128x128xf32, #tpu.memory_space<vmem>>, %arg5: memref<1x128xf32, #tpu.memory_space<vmem>>, %arg6: memref<128x128xf32, #tpu.memory_space<vmem>>, %arg7: memref<1x128xf32, #tpu.memory_space<vmem>>, %arg8: memref<128x128xf32, #tpu.memory_space<vmem>>, %arg9: memref<1x128xf32, #tpu.memory_space<vmem>>, %arg10: memref<128x128xf32, #tpu.memory_space<vmem>>) attributes {dimension_semantics = [], scalar_prefetch = 0 : i64, scratch_operands = 0 : i64, tpu.core_type = #tpu.core_type<tc>} {
    %c0 = arith.constant 0 : index
    %c0_0 = arith.constant 0 : index
    %0 = vector.load %arg0[%c0, %c0_0] : memref<128x128xbf16, #tpu.memory_space<vmem>>, vector<128x128xbf16>
    %c0_1 = arith.constant 0 : index
    %c0_2 = arith.constant 0 : index
    %1 = vector.load %arg1[%c0_1, %c0_2] : memref<128x128xbf16, #tpu.memory_space<vmem>>, vector<128x128xbf16>
    %cst = arith.constant dense<0.000000e+00> : vector<128x128xf32>
    %2 = tpu.matmul %0, %1, %cst {dimension_numbers = #tpu.dot_dimension_numbers<[1], [0], [0], [1], [0, 0, 1, 1], [], []>} : vector<128x128xbf16>, vector<128x128xbf16>, vector<128x128xf32> -> vector<128x128xf32>
    %c0_3 = arith.constant 0 : index
    %c0_4 = arith.constant 0 : index
    %3 = vector.load %arg2[%c0_3, %c0_4] : memref<128x128xf32, #tpu.memory_space<vmem>>, vector<128x128xf32>
    %cst_5 = arith.constant dense<0.000000e+00> : vector<128x128xf32>
    %4 = tpu.matmul %2, %3, %cst_5 {dimension_numbers = #tpu.dot_dimension_numbers<[1], [0], [0], [1], [0, 0, 1, 1], [], []>} : vector<128x128xf32>, vector<128x128xf32>, vector<128x128xf32> -> vector<128x128xf32>
    %c0_6 = arith.constant 0 : index
    %c0_7 = arith.constant 0 : index
    %5 = vector.load %arg3[%c0_6, %c0_7] : memref<1x128xf32, #tpu.memory_space<vmem>>, vector<1x128xf32>
    %6 = vector.broadcast %5 : vector<1x128xf32> to vector<128x128xf32>
    %7 = arith.addf %4, %6 : vector<128x128xf32>
    %8 = arith.truncf %7 : vector<128x128xf32> to vector<128x128xbf16>
    %cst_8 = arith.constant dense<0.000000e+00> : vector<128x128xf32>
    %9 = tpu.matmul %0, %8, %cst_8 {dimension_numbers = #tpu.dot_dimension_numbers<[1], [0], [0], [1], [0, 0, 1, 1], [], []>} : vector<128x128xbf16>, vector<128x128xbf16>, vector<128x128xf32> -> vector<128x128xf32>
    %c0_9 = arith.constant 0 : index
    %c0_10 = arith.constant 0 : index
    %10 = vector.load %arg4[%c0_9, %c0_10] : memref<128x128xf32, #tpu.memory_space<vmem>>, vector<128x128xf32>
    %cst_11 = arith.constant dense<0.000000e+00> : vector<128x128xf32>
    %11 = tpu.matmul %9, %10, %cst_11 {dimension_numbers = #tpu.dot_dimension_numbers<[1], [0], [0], [1], [0, 0, 1, 1], [], []>} : vector<128x128xf32>, vector<128x128xf32>, vector<128x128xf32> -> vector<128x128xf32>
    %c0_12 = arith.constant 0 : index
    %c0_13 = arith.constant 0 : index
    %12 = vector.load %arg5[%c0_12, %c0_13] : memref<1x128xf32, #tpu.memory_space<vmem>>, vector<1x128xf32>
    %13 = vector.broadcast %12 : vector<1x128xf32> to vector<128x128xf32>
    %14 = arith.addf %11, %13 : vector<128x128xf32>
    %c0_14 = arith.constant 0 : index
    %c0_15 = arith.constant 0 : index
    %15 = vector.load %arg6[%c0_14, %c0_15] : memref<128x128xf32, #tpu.memory_space<vmem>>, vector<128x128xf32>
    %cst_16 = arith.constant dense<0.000000e+00> : vector<128x128xf32>
    %16 = tpu.matmul %14, %15, %cst_16 {dimension_numbers = #tpu.dot_dimension_numbers<[1], [0], [0], [1], [0, 0, 1, 1], [], []>} : vector<128x128xf32>, vector<128x128xf32>, vector<128x128xf32> -> vector<128x128xf32>
    %c0_17 = arith.constant 0 : index
    %c0_18 = arith.constant 0 : index
    %17 = vector.load %arg7[%c0_17, %c0_18] : memref<1x128xf32, #tpu.memory_space<vmem>>, vector<1x128xf32>
    %18 = vector.broadcast %17 : vector<1x128xf32> to vector<128x128xf32>
    %19 = arith.addf %16, %18 : vector<128x128xf32>
    %cst_19 = arith.constant 0.000000e+00 : f32
    %20 = vector.broadcast %cst_19 : f32 to vector<128x128xf32>
    %21 = arith.maximumf %19, %20 : vector<128x128xf32>
    %c0_20 = arith.constant 0 : index
    %c0_21 = arith.constant 0 : index
    %22 = vector.load %arg8[%c0_20, %c0_21] : memref<128x128xf32, #tpu.memory_space<vmem>>, vector<128x128xf32>
    %cst_22 = arith.constant dense<0.000000e+00> : vector<128x128xf32>
    %23 = tpu.matmul %21, %22, %cst_22 {dimension_numbers = #tpu.dot_dimension_numbers<[1], [0], [0], [1], [0, 0, 1, 1], [], []>} : vector<128x128xf32>, vector<128x128xf32>, vector<128x128xf32> -> vector<128x128xf32>
    %c0_23 = arith.constant 0 : index
    %c0_24 = arith.constant 0 : index
    %24 = vector.load %arg9[%c0_23, %c0_24] : memref<1x128xf32, #tpu.memory_space<vmem>>, vector<1x128xf32>
    %25 = vector.broadcast %24 : vector<1x128xf32> to vector<128x128xf32>
    %26 = arith.addf %23, %25 : vector<128x128xf32>
    %27 = arith.mulf %26, %26 : vector<128x128xf32>
    %cst_25 = arith.constant dense<0.000000e+00> : vector<128xf32>
    %28 = vector.multi_reduction <add>, %27, %cst_25 [1] : vector<128x128xf32> to vector<128xf32>
    %29 = vector.shape_cast %28 : vector<128xf32> to vector<128x1xf32>
    %cst_26 = arith.constant 1.000000e-30 : f32
    %30 = vector.broadcast %cst_26 : f32 to vector<128x1xf32>
    %31 = arith.maximumf %29, %30 : vector<128x1xf32>
    %32 = math.rsqrt %31 : vector<128x1xf32>
    %33 = math.absf %26 : vector<128x128xf32>
    %34 = vector.broadcast %32 : vector<128x1xf32> to vector<128x128xf32>
    %35 = arith.mulf %33, %34 : vector<128x128xf32>
    %cst_27 = arith.constant 9.99999997E-7 : f32
    %36 = vector.broadcast %cst_27 : f32 to vector<128x128xf32>
    %37 = arith.maximumf %35, %36 : vector<128x128xf32>
    %c0_28 = arith.constant 0 : index
    %c0_29 = arith.constant 0 : index
    %38 = vector.load %arg10[%c0_28, %c0_29] : memref<128x128xf32, #tpu.memory_space<vmem>>, vector<128x128xf32>
    tpu.vector_store %arg10[%c0_28, %c0_29], %37 {strides = array<i32>} : memref<128x128xf32, #tpu.memory_space<vmem>>, vector<128x128xf32>,
    return
  }
}

</mosaic_0001>

<bundles_post_ra>
// kernel: _forward_padded.1
= control target key start
LH: loop header
LB: loop body
LE: loop exit
PB: predicated region body
PF: predicated region fallthrough
CT: control target
= control target key end

     0   :  { %s2185_s1 = inlined_call_operand.vmem [shape: bf16[128,128], index: 1, kind: input, shape index: {}]   ;;  %s2186_s0 = inlined_call_operand.vmem [shape: bf16[128,128], index: 0, kind: input, shape index: {}]   ;;  %s2187_s2 = inlined_call_operand.vmem [shape: f32[128,128], index: 2, kind: input, shape index: {}]   ;;  %s2188_s4 = inlined_call_operand.vmem [shape: f32[128,128], index: 4, kind: input, shape index: {}]   ;;  %s2189_s3 = inlined_call_operand.vmem [shape: f32[1,128], index: 3, kind: input, shape index: {}]   ;;  %s2190_s6 = inlined_call_operand.vmem [shape: f32[128,128], index: 6, kind: input, shape index: {}]   ;;  %s2191_s8 = inlined_call_operand.vmem [shape: f32[128,128], index: 8, kind: input, shape index: {}]   ;;  %s2192_s5 = inlined_call_operand.vmem [shape: f32[1,128], index: 5, kind: input, shape index: {}]   ;;  %s2193_s7 = inlined_call_operand.vmem [shape: f32[1,128], index: 7, kind: input, shape index: {}]   ;;  %s2194_s9 = inlined_call_operand.vmem [shape: f32[1,128], index: 9, kind: input, shape index: {}]   ;;  %s2195_s10 = inlined_call_operand.vmem [shape: f32[128,128], index: 10, kind: output, shape index: {}]  }
   0x1   :  { %v1670_v0 = vld [vmem:[%s2185_s1 + $0x38] sm:$0xff]   ;;  %v1671_v1 = vld [vmem:[%s2185_s1 + $0x30] sm:$0xff]   ;;  %v1672_v2 = vld [vmem:[%s2185_s1 + $0x28] sm:$0xff]  }
   0x2   :  { %1382 = vmatprep.subr.bf16.mxu0 %v1670_v0  ;;  %v1673_v3 = vld [vmem:[%s2185_s1 + $0x20] sm:$0xff]   ;;  %v1674_v5 = vld [vmem:[%s2185_s1 + $0x18] sm:$0xff]   ;;  %v1675_v6 = vld [vmem:[%s2185_s1 + $0x10] sm:$0xff]  }
   0x3   :  { %1383 = vmatpush3.bf16.msra.mxu0 %v1670_v0  ;;  %v1788_v4 = vld [vmem:[%s2186_s0] sm:$0xff]   ;;  %v276_v7 = vld [vmem:[%s2187_s2 + $0x78] sm:$0xff]  ;;  %v275_v8 = vld [vmem:[%s2187_s2 + $0x70] sm:$0xff] }
   0x4   :  { %1384 = vmatprep.subr.bf16.mxu0 %v1671_v1  ;;  %1398 = vmatprep.mubr.bf16.mxu0 %v1788_v4  ;;  %v274_v9 = vld [vmem:[%s2187_s2 + $0x68] sm:$0xff]  ;;  %v273_v11 = vld [vmem:[%s2187_s2 + $0x60] sm:$0xff]  ;;  %v272_v12 = vld [vmem:[%s2187_s2 + $0x58] sm:$0xff] }
   0x5   :  { %1414 = vmatprep.subr.mxu1 %v276_v7  ;;  %v1676_v10 = vld [vmem:[%s2185_s1 + $0x8] sm:$0xff]   ;;  %v1677_v13 = vld [vmem:[%s2185_s1] sm:$0xff]   ;;  %v271_v14 = vld [vmem:[%s2187_s2 + $0x50] sm:$0xff] }
   0x6   :  { %1415 = vmatpush3.msra.mxu1 %v276_v7  ;;  %v270_v15 = vld [vmem:[%s2187_s2 + $0x48] sm:$0xff]  ;;  %v269_v16 = vld [vmem:[%s2187_s2 + $0x40] sm:$0xff]  ;;  %v268_v18 = vld [vmem:[%s2187_s2 + $0x38] sm:$0xff] }
   0x7   :  { %1385 = vmatpush3.bf16.msra.mxu0 %v1671_v1  ;;  %1416 = vmatprep.subr.mxu1 %v275_v8  ;;  %v1830_v17 = vld [vmem:[%s2186_s0 + $0x8] sm:$0xff]   ;;  %v1838_v19 = vld [vmem:[%s2186_s0 + $0x10] sm:$0xff]   ;;  %v265_v22 = vld [vmem:[%s2187_s2 + $0x20] sm:$0xff] }
   0x8   :  { %1386 = vmatprep.subr.bf16.mxu0 %v1672_v2  ;;  %1417 = vmatpush3.msra.mxu1 %v275_v8  ;;  %v267_v20 = vld [vmem:[%s2187_s2 + $0x30] sm:$0xff]  ;;  %v266_v21 = vld [vmem:[%s2187_s2 + $0x28] sm:$0xff]  ;;  %v1854_v23 = vld [vmem:[%s2186_s0 + $0x18] sm:$0xff]  }
   0x9   :  { %1418 = vmatprep.subr.mxu1 %v274_v9  ;;  %v264_v24 = vld [vmem:[%s2187_s2 + $0x18] sm:$0xff]  ;;  %v1862_v25 = vld [vmem:[%s2186_s0 + $0x20] sm:$0xff]   ;;  %v1869_v26 = vld [vmem:[%s2186_s0 + $0x28] sm:$0xff]  }
   0xa   :  { %1419 = vmatpush3.msra.mxu1 %v274_v9  ;;  %v1874_v27 = vld [vmem:[%s2186_s0 + $0x30] sm:$0xff]   ;;  %v1881_v28 = vld [vmem:[%s2186_s0 + $0x38] sm:$0xff]   ;;  %v262_v30 = vld [vmem:[%s2187_s2 + $0x8] sm:$0xff] }
   0xb   :  { %1387 = vmatpush3.bf16.msra.mxu0 %v1672_v2  ;;  %1420 = vmatprep.subr.mxu1 %v273_v11  ;;  %v263_v29 = vld [vmem:[%s2187_s2 + $0x10] sm:$0xff]  ;;  %v261_v31 = vld [vmem:[%s2187_s2] sm:$0xff]  ;;  %v549_v48 = vld [vmem:[%s2188_s4 + $0x78] sm:$0xff] }
   0xc   :  { %1388 = vmatprep.subr.bf16.mxu0 %v1673_v3  ;;  %1421 = vmatpush3.msra.mxu1 %v273_v11  ;;  %v548_v49 = vld [vmem:[%s2188_s4 + $0x70] sm:$0xff]  ;;  %v547_v50 = vld [vmem:[%s2188_s4 + $0x68] sm:$0xff]  ;;  %v546_v51 = vld [vmem:[%s2188_s4 + $0x60] sm:$0xff] }
   0xd   :  { %1422 = vmatprep.subr.mxu1 %v272_v12  ;;  %v545_v52 = vld [vmem:[%s2188_s4 + $0x58] sm:$0xff]  ;;  %v544_v53 = vld [vmem:[%s2188_s4 + $0x50] sm:$0xff]  ;;  %v543_v54 = vld [vmem:[%s2188_s4 + $0x48] sm:$0xff] }
   0xe   :  { %1423 = vmatpush3.msra.mxu1 %v272_v12  ;;  %v542_v55 = vld [vmem:[%s2188_s4 + $0x40] sm:$0xff]  ;;  %v541_v56 = vld [vmem:[%s2188_s4 + $0x38] sm:$0xff]  ;;  %v540_v57 = vld [vmem:[%s2188_s4 + $0x30] sm:$0xff] }
   0xf   :  { %1389 = vmatpush3.bf16.msra.mxu0 %v1673_v3  ;;  %1424 = vmatprep.subr.mxu1 %v271_v14  ;;  %v539_v58 = vld [vmem:[%s2188_s4 + $0x28] sm:$0xff]  ;;  %v538_v59 = vld [vmem:[%s2188_s4 + $0x20] sm:$0xff]  ;;  %v537_v60 = vld [vmem:[%s2188_s4 + $0x18] sm:$0xff] }
  0x10   :  { %1390 = vmatprep.subr.bf16.mxu0 %v1674_v5  ;;  %1425 = vmatpush3.msra.mxu1 %v271_v14  ;;  %v1218_v12 = vld [vmem:[%s2189_s3] ss:$0 sm:$0xff] }
  0x11   :  { %1426 = vmatprep.subr.mxu1 %v270_v15 }
  0x12   :  { %1427 = vmatpush3.msra.mxu1 %v270_v15 }
  0x13   :  { %1391 = vmatpush3.bf16.msra.mxu0 %v1674_v5  ;;  %1428 = vmatprep.subr.mxu1 %v269_v16 }
  0x14   :  { %1392 = vmatprep.subr.bf16.mxu0 %v1675_v6  ;;  %1429 = vmatpush3.msra.mxu1 %v269_v16 }
  0x15   :  { %1430 = vmatprep.subr.mxu1 %v268_v18 }
  0x16   :  { %1431 = vmatpush3.msra.mxu1 %v268_v18 }
  0x17   :  { %1393 = vmatpush3.bf16.msra.mxu0 %v1675_v6  ;;  %1432 = vmatprep.subr.mxu1 %v267_v20 }
  0x18   :  { %1394 = vmatprep.subr.bf16.mxu0 %v1676_v10  ;;  %1433 = vmatpush3.msra.mxu1 %v267_v20 }
  0x19   :  { %1434 = vmatprep.subr.mxu1 %v266_v21 }
  0x1a   :  { %1435 = vmatpush3.msra.mxu1 %v266_v21 }
  0x1b   :  { %1395 = vmatpush3.bf16.msra.mxu0 %v1676_v10  ;;  %1436 = vmatprep.subr.mxu1 %v265_v22 }
  0x1c   :  { %1396 = vmatprep.subr.bf16.mxu0 %v1677_v13  ;;  %1437 = vmatpush3.msra.mxu1 %v265_v22 }
  0x1d   :  { %1438 = vmatprep.subr.mxu1 %v264_v24 }
  0x1e   :  { %1439 = vmatpush3.msra.mxu1 %v264_v24 }
  0x1f   :  { %1397 = vmatpush3.bf16.msra.mxu0 %v1677_v13  ;;  %1440 = vmatprep.subr.mxu1 %v263_v29 }
  0x20   :  { %1441 = vmatpush3.msra.mxu1 %v263_v29 }
  0x21   :  { %1442 = vmatprep.subr.mxu1 %v262_v30 }
  0x22   :  { %1399 = vmatmul.mubr.bf16.vlgmr.msra.gmra.mxu0 %v1830_v17  ;;  %1443 = vmatpush3.msra.mxu1 %v262_v30 }
  0x23   :  { %1402 = vmatprep.mubr.bf16.mxu0 %v1838_v19  ;;  %1444 = vmatprep.subr.mxu1 %v261_v31 }
  0x24   :  { %1445 = vmatpush3.msra.mxu1 %v261_v31 }
  0x25   :  { %1502 = vmatprep.subr.mxu1 %v549_v48 }
  0x2a   :  { %1403 = vmatmul.mubr.bf16.gmra.mxu0 %v1854_v23 }
  0x2b   :  { %1406 = vmatprep.mubr.bf16.mxu0 %v1862_v25 }
  0x32   :  { %1407 = vmatmul.mubr.bf16.gmra.mxu0 %v1869_v26 }
  0x33   :  { %1410 = vmatprep.mubr.bf16.mxu0 %v1874_v27 }
  0x3a   :  { %1411 = vmatmul.mubr.bf16.gmra.mxu0 %v1881_v28 }
  0x3b   :  { %1486 = vmatprep.mubr.bf16.mxu0 %v1788_v4 }
  0xe2   :  { %v1400_v32 = vpop.f32.mrf.mxu0 }
  0xe4   :  { %v198_v33 = vpop.f32.mrf.mxu0 }
  0xe5   :  { %1446 = vmatprep.mubr.f32.mxu1 %v198_v33 }
  0xe6   :  { %v1401_v34 = vpop.f32.mrf.mxu0 }
  0xe8   :  { %v201_v35 = vpop.f32.mrf.mxu0 }
  0xe9   :  { %1447 = vmatmul.mubr.f32.vlgmr.msra.gmra.mxu1 %v201_v35 }
  0xea   :  { %v1404_v36 = vpop.f32.mrf.mxu0  ;;  %1449 = vmatprep.mubr.f32.mxu1 %v1400_v32  ;;  %1503 = vmatpush3.msra.mxu1 %v549_v48  ;;  %v710_v48 = vld [vmem:[%s2190_s6 + $0x40] sm:$0xff] }
  0xeb   :  { %1504 = vmatprep.subr.mxu1 %v548_v49 }
  0xec   :  { %v214_v37 = vpop.f32.mrf.mxu0  ;;  %1505 = vmatpush3.msra.mxu1 %v548_v49  ;;  %v709_v49 = vld [vmem:[%s2190_s6 + $0x38] sm:$0xff] }
  0xed   :  { %1450 = vmatmul.mubr.f32.gmra.mxu1 %v1401_v34  ;;  %1506 = vmatprep.subr.mxu1 %v547_v50 }
  0xee   :  { %v1405_v38 = vpop.f32.mrf.mxu0  ;;  %1452 = vmatprep.mubr.f32.mxu1 %v214_v37  ;;  %1507 = vmatpush3.msra.mxu1 %v547_v50  ;;  %v708_v50 = vld [vmem:[%s2190_s6 + $0x30] sm:$0xff] }
  0xef   :  { %1508 = vmatprep.subr.mxu1 %v546_v51 }
  0xf0   :  { %v217_v39 = vpop.f32.mrf.mxu0  ;;  %1509 = vmatpush3.msra.mxu1 %v546_v51  ;;  %v707_v51 = vld [vmem:[%s2190_s6 + $0x28] sm:$0xff] }
  0xf1   :  { %1453 = vmatmul.mubr.f32.gmra.mxu1 %v217_v39  ;;  %1510 = vmatprep.subr.mxu1 %v545_v52 }
  0xf2   :  { %v1408_v40 = vpop.f32.mrf.mxu0  ;;  %1455 = vmatprep.mubr.f32.mxu1 %v1404_v36  ;;  %1511 = vmatpush3.msra.mxu1 %v545_v52  ;;  %v706_v52 = vld [vmem:[%s2190_s6 + $0x20] sm:$0xff] }
  0xf3   :  { %1512 = vmatprep.subr.mxu1 %v544_v53 }
  0xf4   :  { %v230_v41 = vpop.f32.mrf.mxu0  ;;  %1513 = vmatpush3.msra.mxu1 %v544_v53  ;;  %v705_v53 = vld [vmem:[%s2190_s6 + $0x18] sm:$0xff] }
  0xf5   :  { %1456 = vmatmul.mubr.f32.gmra.mxu1 %v1405_v38  ;;  %1514 = vmatprep.subr.mxu1 %v543_v54 }
  0xf6   :  { %v1409_v42 = vpop.f32.mrf.mxu0  ;;  %1458 = vmatprep.mubr.f32.mxu1 %v230_v41  ;;  %1515 = vmatpush3.msra.mxu1 %v543_v54 }
  0xf7   :  { %1516 = vmatprep.subr.mxu1 %v542_v55 }
  0xf8   :  { %v233_v43 = vpop.f32.mrf.mxu0  ;;  %1517 = vmatpush3.msra.mxu1 %v542_v55 }
  0xf9   :  { %1459 = vmatmul.mubr.f32.gmra.mxu1 %v233_v43  ;;  %1518 = vmatprep.subr.mxu1 %v541_v56 }
  0xfa   :  { %v1412_v44 = vpop.f32.mrf.mxu0  ;;  %1461 = vmatprep.mubr.f32.mxu1 %v1408_v40  ;;  %1519 = vmatpush3.msra.mxu1 %v541_v56 }
  0xfb   :  { %1520 = vmatprep.subr.mxu1 %v540_v57 }
  0xfc   :  { %v246_v45 = vpop.f32.mrf.mxu0  ;;  %1521 = vmatpush3.msra.mxu1 %v540_v57 }
  0xfd   :  { %1462 = vmatmul.mubr.f32.gmra.mxu1 %v1409_v42  ;;  %1522 = vmatprep.subr.mxu1 %v539_v58 }
  0xfe   :  { %v1413_v46 = vpop.f32.mrf.mxu0  ;;  %1464 = vmatprep.mubr.f32.mxu1 %v246_v45  ;;  %1523 = vmatpush3.msra.mxu1 %v539_v58  ;;  %v536_v45 = vld [vmem:[%s2188_s4 + $0x10] sm:$0xff] }
  0xff   :  { %1524 = vmatprep.subr.mxu1 %v538_v59 }
 0x100   :  { %v249_v47 = vpop.f32.mrf.mxu0  ;;  %1525 = vmatpush3.msra.mxu1 %v538_v59 }
 0x101   :  { %1465 = vmatmul.mubr.f32.gmra.mxu1 %v249_v47  ;;  %1526 = vmatprep.subr.mxu1 %v537_v60  ;;  %v711_v47 = vld [vmem:[%s2190_s6 + $0x48] sm:$0xff] }
 0x102   :  { %1467 = vmatprep.mubr.f32.mxu1 %v1412_v44  ;;  %1527 = vmatpush3.msra.mxu1 %v537_v60 }
 0x103   :  { %1528 = vmatprep.subr.mxu1 %v536_v45 }
 0x104   :  { %1529 = vmatpush3.msra.mxu1 %v536_v45 }
 0x105   :  { %1468 = vmatmul.mubr.f32.gmra.mxu1 %v1413_v46  ;;  %v712_v46 = vld [vmem:[%s2190_s6 + $0x50] sm:$0xff] }
 0x1a9   :  { %v1448_v61 = vpop.f32.mrf.mxu1 }
 0x1aa   :  { %v356_v43 = vadd.f32 %v1448_v61, %v1218_v12 }
 0x1ab   :  { %v350_v62 = vpop.f32.mrf.mxu1 }
 0x1ac   :  { %v351_v41 = vadd.f32 %v1218_v12, %v350_v62 }
 0x1ad   :  { %v1451_v63 = vpop.f32.mrf.mxu1 }
 0x1ae   :  { %v366_v40 = vadd.f32 %v1451_v63, %v1218_v12  ;;  %v429_v44 = vpack.c.bf16 %v356_v43, %v351_v41 }
 0x1af   :  { %v360_v0 = vpop.f32.mrf.mxu1 }
 0x1b0   :  { %v361_v38 = vadd.f32 %v1218_v12, %v360_v0 }
 0x1b1   :  { %v1454_v1 = vpop.f32.mrf.mxu1 }
 0x1b2   :  { %v376_v37 = vadd.f32 %v1454_v1, %v1218_v12  ;;  %v430_v42 = vpack.c.bf16 %v366_v40, %v361_v38 }
 0x1b3   :  { %v370_v2 = vpop.f32.mrf.mxu1 }
 0x1b4   :  { %v371_v35 = vadd.f32 %v1218_v12, %v370_v2 }
 0x1b5   :  { %v1457_v3 = vpop.f32.mrf.mxu1 }
 0x1b6   :  { %v386_v34 = vadd.f32 %v1457_v3, %v1218_v12  ;;  %v431_v39 = vpack.c.bf16 %v376_v37, %v371_v35 }
 0x1b7   :  { %v380_v4 = vpop.f32.mrf.mxu1 }
 0x1b8   :  { %v381_v32 = vadd.f32 %v1218_v12, %v380_v4 }
 0x1b9   :  { %v1460_v5 = vpop.f32.mrf.mxu1 }
 0x1ba   :  { %v396_v31 = vadd.f32 %v1460_v5, %v1218_v12  ;;  %v432_v36 = vpack.c.bf16 %v386_v34, %v381_v32 }
 0x1bb   :  { %v390_v6 = vpop.f32.mrf.mxu1 }
 0x1bc   :  { %v391_v29 = vadd.f32 %v1218_v12, %v390_v6  ;;  %v704_v6 = vld [vmem:[%s2190_s6 + $0x10] sm:$0xff] }
 0x1bd   :  { %v1463_v7 = vpop.f32.mrf.mxu1 }
 0x1be   :  { %v406_v24 = vadd.f32 %v1463_v7, %v1218_v12  ;;  %v433_v33 = vpack.c.bf16 %v396_v31, %v391_v29  ;;  %v703_v7 = vld [vmem:[%s2190_s6 + $0x8] sm:$0xff]  ;;  %v1219_v29 = vld [vmem:[%s2192_s5] ss:$0 sm:$0xff] }
 0x1bf   :  { %v400_v8 = vpop.f32.mrf.mxu1 }
 0x1c0   :  { %v401_v21 = vadd.f32 %v1218_v12, %v400_v8  ;;  %v702_v8 = vld [vmem:[%s2190_s6] sm:$0xff] }
 0x1c1   :  { %v1466_v9 = vpop.f32.mrf.mxu1 }
 0x1c2   :  { %v416_v18 = vadd.f32 %v1466_v9, %v1218_v12  ;;  %v434_v30 = vpack.c.bf16 %v406_v24, %v401_v21  ;;  %v901_v9 = vld [vmem:[%s2191_s8 + $0x78] sm:$0xff]  ;;  %v891_v21 = vld [vmem:[%s2191_s8 + $0x28] sm:$0xff] }
 0x1c3   :  { %v410_v10 = vpop.f32.mrf.mxu1 }
 0x1c4   :  { %v411_v14 = vadd.f32 %v1218_v12, %v410_v10  ;;  %v900_v10 = vld [vmem:[%s2191_s8 + $0x70] sm:$0xff] }
 0x1c5   :  { %v1469_v11 = vpop.f32.mrf.mxu1 }
 0x1c6   :  { %v426_v15 = vadd.f32 %v1469_v11, %v1218_v12  ;;  %v435_v22 = vpack.c.bf16 %v416_v18, %v411_v14  ;;  %v899_v11 = vld [vmem:[%s2191_s8 + $0x68] sm:$0xff]  ;;  %v896_v14 = vld [vmem:[%s2191_s8 + $0x50] sm:$0xff]  ;;  %v893_v18 = vld [vmem:[%s2191_s8 + $0x38] sm:$0xff] }
 0x1c7   :  { %v420_v13 = vpop.f32.mrf.mxu1 }
 0x1c8   :  { %v421_v16 = vadd.f32 %v1218_v12, %v420_v13  ;;  %v898_v12 = vld [vmem:[%s2191_s8 + $0x60] sm:$0xff]  ;;  %v897_v13 = vld [vmem:[%s2191_s8 + $0x58] sm:$0xff] }
 0x1ca   :  { %v436_v20 = vpack.c.bf16 %v426_v15, %v421_v16  ;;  %v895_v15 = vld [vmem:[%s2191_s8 + $0x48] sm:$0xff]  ;;  %v894_v16 = vld [vmem:[%s2191_s8 + $0x40] sm:$0xff] }
 0x1cc   :  { %1470 = vmatprep.subr.bf16.mxu0 %v436_v20 }
 0x1cd   :  { %1471 = vmatpush3.bf16.msra.mxu0 %v436_v20  ;;  %v892_v20 = vld [vmem:[%s2191_s8 + $0x30] sm:$0xff] }
 0x1ce   :  { %1472 = vmatprep.subr.bf16.mxu0 %v435_v22 }
 0x1d1   :  { %1473 = vmatpush3.bf16.msra.mxu0 %v435_v22  ;;  %v890_v22 = vld [vmem:[%s2191_s8 + $0x20] sm:$0xff] }
 0x1d2   :  { %1474 = vmatprep.subr.bf16.mxu0 %v434_v30 }
 0x1d5   :  { %1475 = vmatpush3.bf16.msra.mxu0 %v434_v30 }
 0x1d6   :  { %1476 = vmatprep.subr.bf16.mxu0 %v433_v33 }
 0x1d9   :  { %1477 = vmatpush3.bf16.msra.mxu0 %v433_v33 }
 0x1da   :  { %1478 = vmatprep.subr.bf16.mxu0 %v432_v36 }
 0x1dd   :  { %1479 = vmatpush3.bf16.msra.mxu0 %v432_v36 }
 0x1de   :  { %1480 = vmatprep.subr.bf16.mxu0 %v431_v39 }
 0x1e1   :  { %1481 = vmatpush3.bf16.msra.mxu0 %v431_v39 }
 0x1e2   :  { %1482 = vmatprep.subr.bf16.mxu0 %v430_v42 }
 0x1e5   :  { %1483 = vmatpush3.bf16.msra.mxu0 %v430_v42 }
 0x1e6   :  { %1484 = vmatprep.subr.bf16.mxu0 %v429_v44 }
 0x1e9   :  { %1485 = vmatpush3.bf16.msra.mxu0 %v429_v44 }
 0x1ec   :  { %1487 = vmatmul.mubr.bf16.vlgmr.msra.gmra.mxu0 %v1830_v17  ;;  %v535_v17 = vld [vmem:[%s2188_s4 + $0x8] sm:$0xff] }
 0x1ed   :  { %1490 = vmatprep.mubr.bf16.mxu0 %v1838_v19  ;;  %1530 = vmatprep.subr.mxu1 %v535_v17  ;;  %v534_v19 = vld [vmem:[%s2188_s4] sm:$0xff] }
 0x1ee   :  { %1531 = vmatpush3.msra.mxu1 %v535_v17 }
 0x1ef   :  { %1532 = vmatprep.subr.mxu1 %v534_v19 }
 0x1f0   :  { %1533 = vmatpush3.msra.mxu1 %v534_v19 }
 0x1f1   :  { %1614 = vmatprep.subr.mxu1 %v901_v9 }
 0x1f4   :  { %1491 = vmatmul.mubr.bf16.gmra.mxu0 %v1854_v23  ;;  %v717_v23 = vld [vmem:[%s2190_s6 + $0x78] sm:$0xff] }
 0x1f5   :  { %1494 = vmatprep.mubr.bf16.mxu0 %v1862_v25  ;;  %v716_v25 = vld [vmem:[%s2190_s6 + $0x70] sm:$0xff]  ;;  %1558 = vmatprep.subr.mxu0 %v717_v23 }
 0x1f6   :  { %1559 = vmatpush3.msra.mxu0 %v717_v23 }
 0x1f7   :  { %1560 = vmatprep.subr.mxu0 %v716_v25 }
 0x1f8   :  { %1561 = vmatpush3.msra.mxu0 %v716_v25 }
 0x1fc   :  { %1495 = vmatmul.mubr.bf16.gmra.mxu0 %v1869_v26  ;;  %v715_v26 = vld [vmem:[%s2190_s6 + $0x68] sm:$0xff] }
 0x1fd   :  { %1498 = vmatprep.mubr.bf16.mxu0 %v1874_v27  ;;  %v714_v27 = vld [vmem:[%s2190_s6 + $0x60] sm:$0xff]  ;;  %1562 = vmatprep.subr.mxu0 %v715_v26 }
 0x1fe   :  { %1563 = vmatpush3.msra.mxu0 %v715_v26 }
 0x1ff   :  { %1564 = vmatprep.subr.mxu0 %v714_v27 }
 0x200   :  { %1565 = vmatpush3.msra.mxu0 %v714_v27 }
 0x204   :  { %1499 = vmatmul.mubr.bf16.gmra.mxu0 %v1881_v28  ;;  %v713_v28 = vld [vmem:[%s2190_s6 + $0x58] sm:$0xff] }
 0x205   :  { %1566 = vmatprep.subr.mxu0 %v713_v28 }
 0x206   :  { %1567 = vmatpush3.msra.mxu0 %v713_v28 }
 0x207   :  { %1568 = vmatprep.subr.mxu0 %v712_v46 }
 0x208   :  { %1569 = vmatpush3.msra.mxu0 %v712_v46 }
 0x209   :  { %1570 = vmatprep.subr.mxu0 %v711_v47 }
 0x20a   :  { %1571 = vmatpush3.msra.mxu0 %v711_v47 }
 0x20b   :  { %1572 = vmatprep.subr.mxu0 %v710_v48 }
 0x20c   :  { %1573 = vmatpush3.msra.mxu0 %v710_v48 }
 0x20d   :  { %1574 = vmatprep.subr.mxu0 %v709_v49 }
 0x20e   :  { %1575 = vmatpush3.msra.mxu0 %v709_v49 }
 0x20f   :  { %1576 = vmatprep.subr.mxu0 %v708_v50 }
 0x210   :  { %1577 = vmatpush3.msra.mxu0 %v708_v50 }
 0x211   :  { %1578 = vmatprep.subr.mxu0 %v707_v51 }
 0x212   :  { %1579 = vmatpush3.msra.mxu0 %v707_v51 }
 0x213   :  { %1580 = vmatprep.subr.mxu0 %v706_v52 }
 0x214   :  { %1581 = vmatpush3.msra.mxu0 %v706_v52 }
 0x215   :  { %1582 = vmatprep.subr.mxu0 %v705_v53 }
 0x216   :  { %1583 = vmatpush3.msra.mxu0 %v705_v53 }
 0x217   :  { %1584 = vmatprep.subr.mxu0 %v704_v6 }
 0x218   :  { %1585 = vmatpush3.msra.mxu0 %v704_v6 }
 0x219   :  { %1586 = vmatprep.subr.mxu0 %v703_v7 }
 0x21a   :  { %1587 = vmatpush3.msra.mxu0 %v703_v7 }
 0x21b   :  { %1588 = vmatprep.subr.mxu0 %v702_v8 }
 0x21c   :  { %1589 = vmatpush3.msra.mxu0 %v702_v8 }
 0x2ac   :  { %v1488_v54 = vpop.f32.mrf.mxu0 }
 0x2ae   :  { %v471_v55 = vpop.f32.mrf.mxu0 }
 0x2af   :  { %1534 = vmatprep.mubr.f32.mxu1 %v471_v55  ;;  %v888_v55 = vld [vmem:[%s2191_s8 + $0x10] sm:$0xff] }
 0x2b0   :  { %v1489_v56 = vpop.f32.mrf.mxu0 }
 0x2b2   :  { %v474_v57 = vpop.f32.mrf.mxu0 }
 0x2b3   :  { %1535 = vmatmul.mubr.f32.vlgmr.msra.gmra.mxu1 %v474_v57  ;;  %v886_v57 = vld [vmem:[%s2191_s8] sm:$0xff] }
 0x2b4   :  { %v1492_v58 = vpop.f32.mrf.mxu0  ;;  %1537 = vmatprep.mubr.f32.mxu1 %v1488_v54  ;;  %1615 = vmatpush3.msra.mxu1 %v901_v9  ;;  %v889_v54 = vld [vmem:[%s2191_s8 + $0x18] sm:$0xff] }
 0x2b5   :  { %1616 = vmatprep.subr.mxu1 %v900_v10 }
 0x2b6   :  { %v487_v59 = vpop.f32.mrf.mxu0  ;;  %1617 = vmatpush3.msra.mxu1 %v900_v10 }
 0x2b7   :  { %1538 = vmatmul.mubr.f32.gmra.mxu1 %v1489_v56  ;;  %1618 = vmatprep.subr.mxu1 %v899_v11  ;;  %v887_v56 = vld [vmem:[%s2191_s8 + $0x8] sm:$0xff] }
 0x2b8   :  { %v1493_v60 = vpop.f32.mrf.mxu0  ;;  %1540 = vmatprep.mubr.f32.mxu1 %v487_v59  ;;  %1619 = vmatpush3.msra.mxu1 %v899_v11 }
 0x2b9   :  { %1620 = vmatprep.subr.mxu1 %v898_v12 }
 0x2ba   :  { %v490_v61 = vpop.f32.mrf.mxu0  ;;  %1621 = vmatpush3.msra.mxu1 %v898_v12 }
 0x2bb   :  { %1541 = vmatmul.mubr.f32.gmra.mxu1 %v490_v61  ;;  %1622 = vmatprep.subr.mxu1 %v897_v13 }
 0x2bc   :  { %v1496_v62 = vpop.f32.mrf.mxu0  ;;  %1543 = vmatprep.mubr.f32.mxu1 %v1492_v58  ;;  %1623 = vmatpush3.msra.mxu1 %v897_v13  ;;  %v1220_v58 = vld [vmem:[%s2193_s7] ss:$0 sm:$0xff] }
 0x2bd   :  { %1624 = vmatprep.subr.mxu1 %v896_v14 }
 0x2be   :  { %v503_v63 = vpop.f32.mrf.mxu0  ;;  %1625 = vmatpush3.msra.mxu1 %v896_v14 }
 0x2bf   :  { %1544 = vmatmul.mubr.f32.gmra.mxu1 %v1493_v60  ;;  %1626 = vmatprep.subr.mxu1 %v895_v15 }
 0x2c0   :  { %v1497_v0 = vpop.f32.mrf.mxu0  ;;  %1546 = vmatprep.mubr.f32.mxu1 %v503_v63  ;;  %1627 = vmatpush3.msra.mxu1 %v895_v15 }
 0x2c1   :  { %1628 = vmatprep.subr.mxu1 %v894_v16 }
 0x2c2   :  { %v506_v1 = vpop.f32.mrf.mxu0  ;;  %1629 = vmatpush3.msra.mxu1 %v894_v16 }
 0x2c3   :  { %1547 = vmatmul.mubr.f32.gmra.mxu1 %v506_v1  ;;  %1630 = vmatprep.subr.mxu1 %v893_v18 }
 0x2c4   :  { %v1500_v2 = vpop.f32.mrf.mxu0  ;;  %1549 = vmatprep.mubr.f32.mxu1 %v1496_v62  ;;  %1631 = vmatpush3.msra.mxu1 %v893_v18 }
 0x2c5   :  { %1632 = vmatprep.subr.mxu1 %v892_v20 }
 0x2c6   :  { %v519_v3 = vpop.f32.mrf.mxu0  ;;  %1633 = vmatpush3.msra.mxu1 %v892_v20 }
 0x2c7   :  { %1550 = vmatmul.mubr.f32.gmra.mxu1 %v1497_v0  ;;  %1634 = vmatprep.subr.mxu1 %v891_v21 }
 0x2c8   :  { %v1501_v4 = vpop.f32.mrf.mxu0  ;;  %1552 = vmatprep.mubr.f32.mxu1 %v519_v3  ;;  %1635 = vmatpush3.msra.mxu1 %v891_v21 }
 0x2c9   :  { %1636 = vmatprep.subr.mxu1 %v890_v22 }
 0x2ca   :  { %v522_v5 = vpop.f32.mrf.mxu0  ;;  %1637 = vmatpush3.msra.mxu1 %v890_v22 }
 0x2cb   :  { %1553 = vmatmul.mubr.f32.gmra.mxu1 %v522_v5  ;;  %1638 = vmatprep.subr.mxu1 %v889_v54 }
 0x2cc   :  { %1555 = vmatprep.mubr.f32.mxu1 %v1500_v2  ;;  %1639 = vmatpush3.msra.mxu1 %v889_v54 }
 0x2cd   :  { %1640 = vmatprep.subr.mxu1 %v888_v55 }
 0x2ce   :  { %1641 = vmatpush3.msra.mxu1 %v888_v55 }
 0x2cf   :  { %1556 = vmatmul.mubr.f32.gmra.mxu1 %v1501_v4  ;;  %1642 = vmatprep.subr.mxu1 %v887_v56 }
 0x2d0   :  { %1643 = vmatpush3.msra.mxu1 %v887_v56 }
 0x2d1   :  { %1644 = vmatprep.subr.mxu1 %v886_v57 }
 0x2d2   :  { %1645 = vmatpush3.msra.mxu1 %v886_v57 }
 0x373   :  { %v1536_v24 = vpop.f32.mrf.mxu1 }
 0x374   :  { %v629_v32 = vadd.f32 %v1536_v24, %v1219_v29 }
 0x375   :  { %v623_v30 = vpop.f32.mrf.mxu1 }
 0x376   :  { %v624_v31 = vadd.f32 %v1219_v29, %v623_v30 }
 0x377   :  { %v1539_v33 = vpop.f32.mrf.mxu1 }
 0x378   :  { %1590 = vmatprep.mubr.f32.mxu0 %v624_v31  ;;  %v639_v36 = vadd.f32 %v1539_v33, %v1219_v29 }
 0x379   :  { %v633_v34 = vpop.f32.mrf.mxu1  ;;  %1591 = vmatmul.mubr.f32.vlgmr.msra.gmra.mxu0 %v629_v32 }
 0x37a   :  { %v634_v35 = vadd.f32 %v1219_v29, %v633_v34 }
 0x37b   :  { %v1542_v37 = vpop.f32.mrf.mxu1 }
 0x37c   :  { %1593 = vmatprep.mubr.f32.mxu0 %v634_v35  ;;  %v649_v40 = vadd.f32 %v1542_v37, %v1219_v29 }
 0x37d   :  { %v643_v38 = vpop.f32.mrf.mxu1  ;;  %1594 = vmatmul.mubr.f32.gmra.mxu0 %v639_v36 }
 0x37e   :  { %v644_v39 = vadd.f32 %v1219_v29, %v643_v38 }
 0x37f   :  { %v1545_v41 = vpop.f32.mrf.mxu1 }
 0x380   :  { %1596 = vmatprep.mubr.f32.mxu0 %v644_v39  ;;  %v659_v44 = vadd.f32 %v1545_v41, %v1219_v29 }
 0x381   :  { %v653_v42 = vpop.f32.mrf.mxu1  ;;  %1597 = vmatmul.mubr.f32.gmra.mxu0 %v649_v40 }
 0x382   :  { %v654_v43 = vadd.f32 %v1219_v29, %v653_v42 }
 0x383   :  { %v1548_v45 = vpop.f32.mrf.mxu1 }
 0x384   :  { %1599 = vmatprep.mubr.f32.mxu0 %v654_v43  ;;  %v669_v23 = vadd.f32 %v1548_v45, %v1219_v29 }
 0x385   :  { %v663_v17 = vpop.f32.mrf.mxu1  ;;  %1600 = vmatmul.mubr.f32.gmra.mxu0 %v659_v44 }
 0x386   :  { %v664_v19 = vadd.f32 %v1219_v29, %v663_v17 }
 0x387   :  { %v1551_v25 = vpop.f32.mrf.mxu1 }
 0x388   :  { %1602 = vmatprep.mubr.f32.mxu0 %v664_v19  ;;  %v679_v28 = vadd.f32 %v1551_v25, %v1219_v29 }
 0x389   :  { %v673_v26 = vpop.f32.mrf.mxu1  ;;  %1603 = vmatmul.mubr.f32.gmra.mxu0 %v669_v23 }
 0x38a   :  { %v674_v27 = vadd.f32 %v1219_v29, %v673_v26  ;;  %v1221_v26 = vld [vmem:[%s2194_s9] ss:$0 sm:$0xff] }
 0x38b   :  { %v1554_v46 = vpop.f32.mrf.mxu1 }
 0x38c   :  { %1605 = vmatprep.mubr.f32.mxu0 %v674_v27  ;;  %v689_v49 = vadd.f32 %v1554_v46, %v1219_v29 }
 0x38d   :  { %v683_v47 = vpop.f32.mrf.mxu1  ;;  %1606 = vmatmul.mubr.f32.gmra.mxu0 %v679_v28 }
 0x38e   :  { %v684_v48 = vadd.f32 %v1219_v29, %v683_v47 }
 0x38f   :  { %v1557_v50 = vpop.f32.mrf.mxu1 }
 0x390   :  { %1608 = vmatprep.mubr.f32.mxu0 %v684_v48  ;;  %v699_v53 = vadd.f32 %v1557_v50, %v1219_v29 }
 0x391   :  { %v693_v51 = vpop.f32.mrf.mxu1  ;;  %1609 = vmatmul.mubr.f32.gmra.mxu0 %v689_v49 }
 0x392   :  { %v694_v52 = vadd.f32 %v1219_v29, %v693_v51 }
 0x394   :  { %1611 = vmatprep.mubr.f32.mxu0 %v694_v52 }
 0x395   :  { %1612 = vmatmul.mubr.f32.gmra.mxu0 %v699_v53 }
 0x439   :  { %v1592_v59 = vpop.f32.mrf.mxu0 }
 0x43a   :  { %v797_v60 = vadd.f32 %v1592_v59, %v1220_v58 }
 0x43b   :  { %v791_v61 = vpop.f32.mrf.mxu0 }
 0x43c   :  { %v792_v62 = vadd.f32 %v1220_v58, %v791_v61  ;;  %v871_v1 = vmax.f32 %v797_v60, 0.0 }
 0x43d   :  { %v1595_v63 = vpop.f32.mrf.mxu0 }
 0x43e   :  { %v870_v0 = vmax.f32 %v792_v62, 0.0  ;;  %v807_v2 = vadd.f32 %v1595_v63, %v1220_v58 }
 0x43f   :  { %v801_v3 = vpop.f32.mrf.mxu0 }
 0x440   :  { %v802_v4 = vadd.f32 %v1220_v58, %v801_v3  ;;  %1646 = vmatprep.mubr.f32.mxu1 %v870_v0  ;;  %v873_v7 = vmax.f32 %v807_v2, 0.0 }
 0x441   :  { %v1598_v5 = vpop.f32.mrf.mxu0  ;;  %1647 = vmatmul.mubr.f32.vlgmr.msra.gmra.mxu1 %v871_v1 }
 0x442   :  { %v872_v6 = vmax.f32 %v802_v4, 0.0  ;;  %v817_v8 = vadd.f32 %v1598_v5, %v1220_v58 }
 0x443   :  { %v811_v9 = vpop.f32.mrf.mxu0 }
 0x444   :  { %v812_v10 = vadd.f32 %v1220_v58, %v811_v9  ;;  %1649 = vmatprep.mubr.f32.mxu1 %v872_v6  ;;  %v875_v13 = vmax.f32 %v817_v8, 0.0 }
 0x445   :  { %v1601_v11 = vpop.f32.mrf.mxu0  ;;  %1650 = vmatmul.mubr.f32.gmra.mxu1 %v873_v7 }
 0x446   :  { %v874_v12 = vmax.f32 %v812_v10, 0.0  ;;  %v827_v14 = vadd.f32 %v1601_v11, %v1220_v58 }
 0x447   :  { %v821_v15 = vpop.f32.mrf.mxu0 }
 0x448   :  { %v822_v16 = vadd.f32 %v1220_v58, %v821_v15  ;;  %1652 = vmatprep.mubr.f32.mxu1 %v874_v12  ;;  %v877_v21 = vmax.f32 %v827_v14, 0.0 }
 0x449   :  { %v1604_v18 = vpop.f32.mrf.mxu0  ;;  %1653 = vmatmul.mubr.f32.gmra.mxu1 %v875_v13 }
 0x44a   :  { %v876_v20 = vmax.f32 %v822_v16, 0.0  ;;  %v837_v22 = vadd.f32 %v1604_v18, %v1220_v58 }
 0x44b   :  { %v831_v24 = vpop.f32.mrf.mxu0 }
 0x44c   :  { %v832_v29 = vadd.f32 %v1220_v58, %v831_v24  ;;  %1655 = vmatprep.mubr.f32.mxu1 %v876_v20  ;;  %v879_v32 = vmax.f32 %v837_v22, 0.0 }
 0x44d   :  { %v1607_v30 = vpop.f32.mrf.mxu0  ;;  %1656 = vmatmul.mubr.f32.gmra.mxu1 %v877_v21 }
 0x44e   :  { %v878_v31 = vmax.f32 %v832_v29, 0.0  ;;  %v847_v33 = vadd.f32 %v1607_v30, %v1220_v58 }
 0x44f   :  { %v841_v34 = vpop.f32.mrf.mxu0 }
 0x450   :  { %v842_v35 = vadd.f32 %v1220_v58, %v841_v34  ;;  %1658 = vmatprep.mubr.f32.mxu1 %v878_v31  ;;  %v881_v38 = vmax.f32 %v847_v33, 0.0 }
 0x451   :  { %v1610_v36 = vpop.f32.mrf.mxu0  ;;  %1659 = vmatmul.mubr.f32.gmra.mxu1 %v879_v32 }
 0x452   :  { %v880_v37 = vmax.f32 %v842_v35, 0.0  ;;  %v857_v39 = vadd.f32 %v1610_v36, %v1220_v58 }
 0x453   :  { %v851_v40 = vpop.f32.mrf.mxu0 }
 0x454   :  { %v852_v41 = vadd.f32 %v1220_v58, %v851_v40  ;;  %1661 = vmatprep.mubr.f32.mxu1 %v880_v37  ;;  %v883_v44 = vmax.f32 %v857_v39, 0.0 }
 0x455   :  { %v1613_v42 = vpop.f32.mrf.mxu0  ;;  %1662 = vmatmul.mubr.f32.gmra.mxu1 %v881_v38 }
 0x456   :  { %v882_v43 = vmax.f32 %v852_v41, 0.0  ;;  %v867_v45 = vadd.f32 %v1613_v42, %v1220_v58 }
 0x457   :  { %v861_v17 = vpop.f32.mrf.mxu0 }
 0x458   :  { %v862_v19 = vadd.f32 %v1220_v58, %v861_v17  ;;  %1664 = vmatprep.mubr.f32.mxu1 %v882_v43  ;;  %v885_v25 = vmax.f32 %v867_v45, 0.0 }
 0x459   :  { %1665 = vmatmul.mubr.f32.gmra.mxu1 %v883_v44 }
 0x45a   :  { %v884_v23 = vmax.f32 %v862_v19, 0.0 }
 0x45c   :  { %1667 = vmatprep.mubr.f32.mxu1 %v884_v23 }
 0x45d   :  { %1668 = vmatmul.mubr.f32.gmra.mxu1 %v885_v25 }
 0x501   :  { %v1648_v27 = vpop.f32.mrf.mxu1 }
 0x502   :  { %v2057_v28 = vadd.f32 %v1648_v27, %v1221_v26 }
 0x503   :  { %v975_v46 = vpop.f32.mrf.mxu1 }
 0x504   :  { %v2059_v47 = vadd.f32 %v1221_v26, %v975_v46  ;;  %v1055_v48 = vmul.f32 %v2057_v28, %v2057_v28  ;;  %v1135_v23 = vand.u32 2147483647, %v2057_v28 }
 0x505   :  { %v1651_v49 = vpop.f32.mrf.mxu1 }
 0x506   :  { %v2063_v50 = vadd.f32 %v1651_v49, %v1221_v26  ;;  %1072 = vadd.xlane.f32.xlu0 %v1055_v48  ;;  %v1054_v54 = vmul.f32 %v2059_v47, %v2059_v47 }
 0x507   :  { %v985_v51 = vpop.f32.mrf.mxu1 }
 0x508   :  { %v2065_v52 = vadd.f32 %v1221_v26, %v985_v51  ;;  %v1057_v53 = vmul.f32 %v2063_v50, %v2063_v50  ;;  %v1137_v51 = vand.u32 2147483647, %v2063_v50 }
 0x509   :  { %v1654_v55 = vpop.f32.mrf.mxu1 }
 0x50a   :  { %1076 = vadd.xlane.f32.xlu1 %v1057_v53  ;;  %1070 = vadd.xlane.f32.xlu0 %v1054_v54  ;;  %v2071_v57 = vadd.f32 %v1654_v55, %v1221_v26  ;;  %v1056_v59 = vmul.f32 %v2065_v52, %v2065_v52 }
 0x50b   :  { %v995_v56 = vpop.f32.mrf.mxu1 }
 0x50c   :  { %v2073_v58 = vadd.f32 %v1221_v26, %v995_v56  ;;  %v1059_v1 = vmul.f32 %v2071_v57, %v2071_v57  ;;  %v1134_v56 = vand.u32 2147483647, %v2059_v47 }
 0x50d   :  { %v1657_v60 = vpop.f32.mrf.mxu1 }
 0x50e   :  { %1074 = vadd.xlane.f32.xlu1 %v1056_v59  ;;  %v1058_v61 = vmul.f32 %v2073_v58, %v2073_v58  ;;  %v2079_v63 = vadd.f32 %v1657_v60, %v1221_v26  ;;  %v1138_v47 = vand.u32 2147483647, %v2073_v58 }
 0x50f   :  { %v1005_v62 = vpop.f32.mrf.mxu1 }
 0x510   :  { %v2081_v0 = vadd.f32 %v1221_v26, %v1005_v62  ;;  %1078 = vadd.xlane.f32.xlu0 %v1058_v61  ;;  %v1061_v7 = vmul.f32 %v2079_v63, %v2079_v63 }
 0x511   :  { %v1660_v2 = vpop.f32.mrf.mxu1 }
 0x512   :  { %1080 = vadd.xlane.f32.xlu1 %v1059_v1  ;;  %v1060_v3 = vmul.f32 %v2081_v0, %v2081_v0  ;;  %v2087_v5 = vadd.f32 %v1660_v2, %v1221_v26  ;;  %v1136_v2 = vand.u32 2147483647, %v2065_v52 }
 0x513   :  { %v1015_v4 = vpop.f32.mrf.mxu1 }
 0x514   :  { %v2089_v6 = vadd.f32 %v1221_v26, %v1015_v4  ;;  %1082 = vadd.xlane.f32.xlu0 %v1060_v3  ;;  %v1063_v13 = vmul.f32 %v2087_v5, %v2087_v5 }
 0x515   :  { %v1663_v8 = vpop.f32.mrf.mxu1 }
 0x516   :  { %1084 = vadd.xlane.f32.xlu1 %v1061_v7  ;;  %v1062_v9 = vmul.f32 %v2089_v6, %v2089_v6  ;;  %v2095_v11 = vadd.f32 %v1663_v8, %v1221_v26 }
 0x517   :  { %v1025_v10 = vpop.f32.mrf.mxu1 }
 0x518   :  { %v2097_v12 = vadd.f32 %v1221_v26, %v1025_v10  ;;  %1086 = vadd.xlane.f32.xlu0 %v1062_v9  ;;  %v1065_v21 = vmul.f32 %v2095_v11, %v2095_v11 }
 0x519   :  { %v1666_v14 = vpop.f32.mrf.mxu1 }
 0x51a   :  { %1088 = vadd.xlane.f32.xlu1 %v1063_v13  ;;  %v1064_v15 = vmul.f32 %v2097_v12, %v2097_v12  ;;  %v2103_v18 = vadd.f32 %v1666_v14, %v1221_v26  ;;  %v1139_v14 = vand.u32 2147483647, %v2071_v57 }
 0x51b   :  { %v1035_v16 = vpop.f32.mrf.mxu1 }
 0x51c   :  { %v2105_v20 = vadd.f32 %v1221_v26, %v1035_v16  ;;  %1090 = vadd.xlane.f32.xlu0 %v1064_v15  ;;  %v1067_v32 = vmul.f32 %v2103_v18, %v2103_v18 }
 0x51d   :  { %v1669_v22 = vpop.f32.mrf.mxu1 }
 0x51e   :  { %1092 = vadd.xlane.f32.xlu1 %v1065_v21  ;;  %v1066_v24 = vmul.f32 %v2105_v20, %v2105_v20  ;;  %v2111_v30 = vadd.f32 %v1669_v22, %v1221_v26  ;;  %v1140_v22 = vand.u32 2147483647, %v2081_v0 }
 0x51f   :  { %v1045_v29 = vpop.f32.mrf.mxu1 }
 0x520   :  { %v2113_v31 = vadd.f32 %v1221_v26, %v1045_v29  ;;  %1094 = vadd.xlane.f32.xlu0 %v1066_v24  ;;  %v1069_v34 = vmul.f32 %v2111_v30, %v2111_v30 }
 0x522   :  { %1096 = vadd.xlane.f32.xlu1 %v1067_v32  ;;  %v1068_v33 = vmul.f32 %v2113_v31, %v2113_v31 }
 0x524   :  { %1098 = vadd.xlane.f32.xlu0 %v1068_v33 }
 0x526   :  { %1100 = vadd.xlane.f32.xlu1 %v1069_v34  ;;  %v1141_v34 = vand.u32 2147483647, %v2079_v63 }
 0x58f   :  { %v1073_v35 = vpop.xlane.xlu0 %1072 }
 0x590   :  { %v1103_v36 = vmax.f32 %v1073_v35, 1e-30 }
 0x592   :  { %1686 = vrsqrt.f32 %v1103_v36 }
 0x593   :  { %v1077_v37 = vpop.xlane.xlu1 %1076  ;;  %v1071_v38 = vpop.xlane.xlu0 %1070 }
 0x594   :  { %v1105_v39 = vmax.f32 %v1077_v37, 1e-30  ;;  %v1102_v40 = vmax.f32 %v1071_v38, 1e-30 }
 0x596   :  { %1688 = vrsqrt.f32 %v1105_v39  ;;  %v1142_v39 = vand.u32 2147483647, %v2089_v6 }
 0x597   :  { %1690 = vrsqrt.f32 %v1102_v40  ;;  %v1075_v41 = vpop.xlane.xlu1 %1074 }
 0x598   :  { %v1104_v42 = vmax.f32 %v1075_v41, 1e-30 }
 0x599   :  { %v1079_v43 = vpop.xlane.xlu0 %1078 }
 0x59a   :  { %1692 = vrsqrt.f32 %v1104_v42  ;;  %v1106_v44 = vmax.f32 %v1079_v43, 1e-30 }
 0x59b   :  { %v1081_v45 = vpop.xlane.xlu1 %1080 }
 0x59c   :  { %1694 = vrsqrt.f32 %v1106_v44  ;;  %v1107_v17 = vmax.f32 %v1081_v45, 1e-30  ;;  %v1143_v44 = vand.u32 2147483647, %v2087_v5 }
 0x59d   :  { %v1083_v19 = vpop.xlane.xlu0 %1082 }
 0x59e   :  { %1696 = vrsqrt.f32 %v1107_v17  ;;  %v1108_v25 = vmax.f32 %v1083_v19, 1e-30  ;;  %v1144_v19 = vand.u32 2147483647, %v2097_v12 }
 0x59f   :  { %v1687_v26 = vpop.eup %1686  ;;  %v1085_v27 = vpop.xlane.xlu1 %1084 }
 0x5a0   :  { %v1151_v46 = vmul.f32 %v1687_v26, %v1135_v23  ;;  %1698 = vrsqrt.f32 %v1108_v25  ;;  %v1109_v48 = vmax.f32 %v1085_v27, 1e-30  ;;  %v1145_v27 = vand.u32 2147483647, %v2095_v11 }
 0x5a1   :  { %v1087_v49 = vpop.xlane.xlu0 %1086 }
 0x5a2   :  { %v1167_v53 = vmax.f32 %v1151_v46, 1e-06  ;;  %1700 = vrsqrt.f32 %v1109_v48  ;;  %v1110_v54 = vmax.f32 %v1087_v49, 1e-30  ;;  %v1146_v49 = vand.u32 2147483647, %v2105_v20 }
 0x5a3   :  { %v1689_v55 = vpop.eup %1688  ;;  %v1089_v59 = vpop.xlane.xlu1 %1088 }
 0x5a4   :  { %v1691_v60 = vpop.eup %1690  ;;  %1183 = vst [vmem:[%s2195_s10 + $0x8] sm:$0xff] %v1167_v53  ;;  %v1153_v28 = vmul.f32 %v1689_v55, %v1137_v51  ;;  %1702 = vrsqrt.f32 %v1110_v54  ;;  %v1111_v61 = vmax.f32 %v1089_v59, 1e-30  ;;  %v1147_v54 = vand.u32 2147483647, %v2103_v18 }
 0x5a5   :  { %v1150_v62 = vmul.f32 %v1691_v60, %v1134_v56  ;;  %v1091_v1 = vpop.xlane.xlu0 %1090  ;;  %v1148_v59 = vand.u32 2147483647, %v2113_v31 }
 0x5a6   :  { %v1169_v50 = vmax.f32 %v1153_v28, 1e-06  ;;  %1704 = vrsqrt.f32 %v1111_v61  ;;  %v1112_v3 = vmax.f32 %v1091_v1, 1e-30  ;;  %v1149_v61 = vand.u32 2147483647, %v2111_v30 }
 0x5a7   :  { %v1693_v4 = vpop.eup %1692  ;;  %v1166_v7 = vmax.f32 %v1150_v62, 1e-06  ;;  %v1093_v8 = vpop.xlane.xlu1 %1092 }
 0x5a8   :  { %1185 = vst [vmem:[%s2195_s10 + $0x18] sm:$0xff] %v1169_v50  ;;  %v1152_v9 = vmul.f32 %v1693_v4, %v1136_v2  ;;  %1706 = vrsqrt.f32 %v1112_v3  ;;  %v1113_v10 = vmax.f32 %v1093_v8, 1e-30 }
 0x5a9   :  { %v1695_v13 = vpop.eup %1694  ;;  %1182 = vst [vmem:[%s2195_s10] sm:$0xff] %v1166_v7  ;;  %v1095_v52 = vpop.xlane.xlu0 %1094 }
 0x5aa   :  { %v1168_v15 = vmax.f32 %v1152_v9, 1e-06  ;;  %v1154_v16 = vmul.f32 %v1695_v13, %v1138_v47  ;;  %1708 = vrsqrt.f32 %v1113_v10  ;;  %v1114_v21 = vmax.f32 %v1095_v52, 1e-30 }
 0x5ab   :  { %v1697_v58 = vpop.eup %1696  ;;  %v1097_v24 = vpop.xlane.xlu1 %1096 }
 0x5ac   :  { %1184 = vst [vmem:[%s2195_s10 + $0x10] sm:$0xff] %v1168_v15  ;;  %v1170_v29 = vmax.f32 %v1154_v16, 1e-06  ;;  %v1155_v32 = vmul.f32 %v1697_v58, %v1139_v14  ;;  %1710 = vrsqrt.f32 %v1114_v21  ;;  %v1115_v57 = vmax.f32 %v1097_v24, 1e-30 }
 0x5ad   :  { %v1699_v33 = vpop.eup %1698  ;;  %v1099_v35 = vpop.xlane.xlu0 %1098 }
 0x5ae   :  { %1186 = vst [vmem:[%s2195_s10 + $0x20] sm:$0xff] %v1170_v29  ;;  %v1171_v36 = vmax.f32 %v1155_v32, 1e-06  ;;  %v1156_v37 = vmul.f32 %v1699_v33, %v1140_v22  ;;  %1712 = vrsqrt.f32 %v1115_v57  ;;  %v1116_v0 = vmax.f32 %v1099_v35, 1e-30 }
 0x5af   :  { %v1701_v38 = vpop.eup %1700  ;;  %v1101_v40 = vpop.xlane.xlu1 %1100 }
 0x5b0   :  { %1187 = vst [vmem:[%s2195_s10 + $0x28] sm:$0xff] %v1171_v36  ;;  %v1172_v41 = vmax.f32 %v1156_v37, 1e-06  ;;  %v1157_v42 = vmul.f32 %v1701_v38, %v1141_v34  ;;  %1714 = vrsqrt.f32 %v1116_v0  ;;  %v1117_v63 = vmax.f32 %v1101_v40, 1e-30 }
 0x5b1   :  { %v1703_v43 = vpop.eup %1702 }
 0x5b2   :  { %1188 = vst [vmem:[%s2195_s10 + $0x30] sm:$0xff] %v1172_v41  ;;  %v1173_v45 = vmax.f32 %v1157_v42, 1e-06  ;;  %v1158_v17 = vmul.f32 %v1703_v43, %v1142_v39  ;;  %1716 = vrsqrt.f32 %v1117_v63 }
 0x5b3   :  { %v1705_v6 = vpop.eup %1704 }
 0x5b4   :  { %1189 = vst [vmem:[%s2195_s10 + $0x38] sm:$0xff] %v1173_v45  ;;  %v1174_v23 = vmax.f32 %v1158_v17, 1e-06  ;;  %v1159_v25 = vmul.f32 %v1705_v6, %v1143_v44 }
 0x5b5   :  { %v1707_v26 = vpop.eup %1706 }
 0x5b6   :  { %1190 = vst [vmem:[%s2195_s10 + $0x40] sm:$0xff] %v1174_v23  ;;  %v1175_v5 = vmax.f32 %v1159_v25, 1e-06  ;;  %v1160_v46 = vmul.f32 %v1707_v26, %v1144_v19 }
 0x5b7   :  { %v1709_v48 = vpop.eup %1708 }
 0x5b8   :  { %1191 = vst [vmem:[%s2195_s10 + $0x48] sm:$0xff] %v1175_v5  ;;  %v1176_v12 = vmax.f32 %v1160_v46, 1e-06  ;;  %v1161_v51 = vmul.f32 %v1709_v48, %v1145_v27 }
 0x5b9   :  { %v1711_v53 = vpop.eup %1710 }
 0x5ba   :  { %1192 = vst [vmem:[%s2195_s10 + $0x50] sm:$0xff] %v1176_v12  ;;  %v1177_v11 = vmax.f32 %v1161_v51, 1e-06  ;;  %v1162_v55 = vmul.f32 %v1711_v53, %v1146_v49 }
 0x5bb   :  { %v1713_v56 = vpop.eup %1712 }
 0x5bc   :  { %1193 = vst [vmem:[%s2195_s10 + $0x58] sm:$0xff] %v1177_v11  ;;  %v1178_v20 = vmax.f32 %v1162_v55, 1e-06  ;;  %v1163_v60 = vmul.f32 %v1713_v56, %v1147_v54 }
 0x5bd   :  { %v1715_v28 = vpop.eup %1714 }
 0x5be   :  { %1194 = vst [vmem:[%s2195_s10 + $0x60] sm:$0xff] %v1178_v20  ;;  %v1179_v18 = vmax.f32 %v1163_v60, 1e-06  ;;  %v1164_v62 = vmul.f32 %v1715_v28, %v1148_v59 }
 0x5bf   :  { %v1717_v1 = vpop.eup %1716 }
 0x5c0   :  { %1195 = vst [vmem:[%s2195_s10 + $0x68] sm:$0xff] %v1179_v18  ;;  %v1180_v31 = vmax.f32 %v1164_v62, 1e-06  ;;  %v1165_v2 = vmul.f32 %v1717_v1, %v1149_v61 }
 0x5c2   :  { %1196 = vst [vmem:[%s2195_s10 + $0x70] sm:$0xff] %v1180_v31  ;;  %v1181_v50 = vmax.f32 %v1165_v2, 1e-06 }
 0x5c4   :  { %1197 = vst [vmem:[%s2195_s10 + $0x78] sm:$0xff] %v1181_v50 }

</bundles_post_ra>
